<compile_context>
chip_gen: v7x
topology: tpu7x:2x2x1
jax: 0.10.0
libtpu: 0.0.40
codegen_flags: <defaults>
</compile_context>

<pallas_src>
import jax
import jax.numpy as jnp
from jax.experimental import pallas as pl
from jax.experimental.pallas import tpu as pltpu


def _additional_layer_kernel(x_ref, w_model_ref, w_func_ref, o_ref):
    # inner model: bias-free Linear  (x @ W_model), f32 accumulate on the MXU
    h = jnp.dot(x_ref[...], w_model_ref[...], preferred_element_type=jnp.float32)
    # activation: ReLU (f32 elementwise — no hidden casts on v5e)
    h = jnp.maximum(h, 0.0)
    # feed the second matmul in the weight dtype (bf16 path on v6e/v7x when the
    # caller passes bf16 weights; identity cast for f32)
    h = h.astype(w_func_ref.dtype)
    # func: Linear(num_input, num_output, bias=False), f32 accumulate
    out = jnp.dot(h, w_func_ref[...], preferred_element_type=jnp.float32)
    o_ref[...] = out.astype(o_ref.dtype)


def _round_up(v, m):
    return ((v + m - 1) // m) * m


def additional_layer(x, w_model, w_func, *, block_m=512):
    """x: (N, d_in); w_model: (d_in, num_input); w_func: (num_input, num_output)."""
    n, d_in = x.shape
    num_input, num_output = w_func.shape
    assert w_model.shape == (d_in, num_input)

    # Lane-dense output: pad the output feature axis to a multiple of 128 with
    # zero columns; slice back in the wrapper.  Zero weight columns do not
    # change the math.
    n_out_pad = _round_up(num_output, 128)
    w_func_p = (
        jnp.pad(w_func, ((0, 0), (0, n_out_pad - num_output)))
        if n_out_pad != num_output
        else w_func
    )

    # Batch tile: multiple of 8 (f32 sublane), capped at block_m so the working
    # set (2 inputs x 2 double-buffers + resident weights) stays far under the
    # v7x 64 MiB VMEM budget.
    tm = min(block_m, _round_up(n, 8))
    n_pad = _round_up(n, tm)
    x_p = jnp.pad(x, ((0, n_pad - n), (0, 0))) if n_pad != n else x

    grid = (n_pad // tm,)

    itemsize = x.dtype.itemsize
    flops = 2 * n_pad * (d_in * num_input + num_input * n_out_pad)
    bytes_accessed = (
        n_pad * d_in * itemsize
        + d_in * num_input * w_model.dtype.itemsize
        + num_input * n_out_pad * w_func_p.dtype.itemsize
        + n_pad * n_out_pad * itemsize
    )

    out_padded = pl.pallas_call(
        _additional_layer_kernel,
        out_shape=jax.ShapeDtypeStruct((n_pad, n_out_pad), x.dtype),
        grid_spec=pltpu.PrefetchScalarGridSpec(
            num_scalar_prefetch=0,
            grid=grid,
            in_specs=[
                # activations: tiled along the batch axis (pipelined)
                pl.BlockSpec((tm, d_in), lambda i: (i, 0)),
                # weights: full block, same index every step -> DMA'd once, resident
                pl.BlockSpec((d_in, num_input), lambda i: (0, 0)),
                pl.BlockSpec((num_input, n_out_pad), lambda i: (0, 0)),
            ],
            out_specs=pl.BlockSpec((tm, n_out_pad), lambda i: (i, 0)),
        ),
        compiler_params=pltpu.CompilerParams(
            dimension_semantics=("parallel",),  # megacore sharding on v7x
            vmem_limit_bytes=32 * 1024 * 1024,  # safe on v5e/v6e/v7x
        ),
        cost_estimate=pl.CostEstimate(
            flops=flops, transcendentals=0, bytes_accessed=bytes_accessed
        ),
    )(x_p, w_model, w_func_p)

    # strip batch padding and lane padding
    return out_padded[:n, :num_output]


if __name__ == "__main__":
    # Small shapes consistent with the forward:
    #   x -> model (Linear d_in -> num_input) -> ReLU -> Linear(num_input, num_output)
    N = 50           # batch / number of nodes (not a tile multiple, exercises padding)
    D_IN = 32        # input feature dim of the inner model
    NUM_INPUT = 32   # num_input  (output dim of inner model / input of func)
    NUM_OUTPUT = 16  # num_output

    key = jax.random.PRNGKey(0)
    kx, k1, k2 = jax.random.split(key, 3)

    x = jax.random.normal(kx, (N, D_IN), dtype=jnp.float32)
    # PyTorch stores Linear weights as (out, in); kept pre-transposed (in, out).
    w_model = jax.random.normal(k1, (D_IN, NUM_INPUT), dtype=jnp.float32) * 0.1
    w_func = jax.random.normal(k2, (NUM_INPUT, NUM_OUTPUT), dtype=jnp.float32) * 0.1

    # small block_m so the test actually runs a multi-step grid
    out = jax.block_until_ready(additional_layer(x, w_model, w_func, block_m=16))

    # Pure-JAX reference.
    ref = jnp.maximum(x @ w_model, 0.0) @ w_func
    assert out.shape == (N, NUM_OUTPUT)
    assert jnp.allclose(out, ref, atol=1e-5, rtol=1e-5)

    print("KERNEL_OK")
</pallas_src>

<mosaic_0001>
module attributes {stable_mosaic.version = 11 : i64} {
  func.func @_additional_layer_kernel(%arg0: i32, %arg1: memref<16x32xf32, #tpu.memory_space<vmem>>, %arg2: memref<32x32xf32, #tpu.memory_space<vmem>>, %arg3: memref<32x128xf32, #tpu.memory_space<vmem>>, %arg4: memref<16x128xf32, #tpu.memory_space<vmem>>) attributes {dimension_semantics = [#tpu.dimension_semantics<parallel>], iteration_bounds = array<i64: 4>, scalar_prefetch = 0 : i64, scratch_operands = 0 : i64, tpu.core_type = #tpu.core_type<tc>, window_params = [{transform_indices = @transform_0, window_bounds = array<i64: 16, 32>}, {pipeline_mode = #tpu.pipeline_mode<synchronous>, transform_indices = @transform_1, window_bounds = array<i64: 32, 32>}, {pipeline_mode = #tpu.pipeline_mode<synchronous>, transform_indices = @transform_2, window_bounds = array<i64: 32, 128>}, {transform_indices = @transform_3, window_bounds = array<i64: 16, 128>}]} {
    %c0 = arith.constant 0 : index
    %c0_0 = arith.constant 0 : index
    %0 = vector.load %arg1[%c0, %c0_0] : memref<16x32xf32, #tpu.memory_space<vmem>>, vector<16x32xf32>
    %c0_1 = arith.constant 0 : index
    %c0_2 = arith.constant 0 : index
    %1 = vector.load %arg2[%c0_1, %c0_2] : memref<32x32xf32, #tpu.memory_space<vmem>>, vector<32x32xf32>
    %cst = arith.constant dense<0.000000e+00> : vector<16x32xf32>
    %2 = tpu.matmul %0, %1, %cst {dimension_numbers = #tpu.dot_dimension_numbers<[1], [0], [0], [1], [0, 0, 1, 1], [], []>} : vector<16x32xf32>, vector<32x32xf32>, vector<16x32xf32> -> vector<16x32xf32>
    %cst_3 = arith.constant 0.000000e+00 : f32
    %3 = vector.broadcast %cst_3 : f32 to vector<16x32xf32>
    %4 = arith.maximumf %2, %3 : vector<16x32xf32>
    %c0_4 = arith.constant 0 : index
    %c0_5 = arith.constant 0 : index
    %5 = vector.load %arg3[%c0_4, %c0_5] : memref<32x128xf32, #tpu.memory_space<vmem>>, vector<32x128xf32>
    %cst_6 = arith.constant dense<0.000000e+00> : vector<16x128xf32>
    %6 = tpu.matmul %4, %5, %cst_6 {dimension_numbers = #tpu.dot_dimension_numbers<[1], [0], [0], [1], [0, 0, 1, 1], [], []>} : vector<16x32xf32>, vector<32x128xf32>, vector<16x128xf32> -> vector<16x128xf32>
    %c0_7 = arith.constant 0 : index
    %c0_8 = arith.constant 0 : index
    %7 = vector.load %arg4[%c0_7, %c0_8] : memref<16x128xf32, #tpu.memory_space<vmem>>, vector<16x128xf32>
    tpu.vector_store %arg4[%c0_7, %c0_8], %6 {strides = array<i32>} : memref<16x128xf32, #tpu.memory_space<vmem>>, vector<16x128xf32>,
    return
  }
  func.func @transform_0(%arg0: i32) -> (i32, i32) {
    %c0_i32 = arith.constant 0 : i32
    %c0_i32_0 = arith.constant 0 : i32
    return %arg0, %c0_i32 : i32, i32
  }
  func.func @transform_1(%arg0: i32) -> (i32, i32) {
    %c0_i32 = arith.constant 0 : i32
    %c0_i32_0 = arith.constant 0 : i32
    %c0_i32_1 = arith.constant 0 : i32
    return %c0_i32, %c0_i32_0 : i32, i32
  }
  func.func @transform_2(%arg0: i32) -> (i32, i32) {
    %c0_i32 = arith.constant 0 : i32
    %c0_i32_0 = arith.constant 0 : i32
    %c0_i32_1 = arith.constant 0 : i32
    return %c0_i32, %c0_i32_0 : i32, i32
  }
  func.func @transform_3(%arg0: i32) -> (i32, i32) {
    %c0_i32 = arith.constant 0 : i32
    %c0_i32_0 = arith.constant 0 : i32
    return %arg0, %c0_i32 : i32, i32
  }
}

</mosaic_0001>

<bundles_post_ra>
// kernel: tpu_custom_call.1
= control target key start
LH: loop header
LB: loop body
LE: loop exit
PB: predicated region body
PF: predicated region fallthrough
CT: control target
= control target key end

     0   :  { %8 = vsyncpa [#allocation3], 0  ;;  %s750_s0 = inlined_call_operand.vmem [shape: f32[64,32], index: 0, kind: input, shape index: {}]   ;;  %s751_s1 = inlined_call_operand.vmem [shape: f32[32,32], index: 1, kind: input, shape index: {}]   ;;  %s752_s2 = inlined_call_operand.vmem [shape: f32[32,128], index: 2, kind: input, shape index: {}]   ;;  %s753_s3 = inlined_call_operand.hbm [shape: f32[64,128], index: 3, kind: output, shape index: {}]  }
   0x1   :  { %10 = vsyncpa [#allocation3 + $0x1], 0  ;;  %s620_s12 = smov 0   ;;  %s622_s13 = smov 0  }
   0x2   :  { %s624_s14 = smov 0   ;;  %s626_s15 = smov 0  }
   0x3 LB: > { %s641_s16 = sadd.s32 4294967295, %s595_s15   ;;  %s425_s17 = sadd.s32 4294967294, %s595_s15   ;;  %s595_s15 = sphi %s626_s15, %s759_s15   ;;  %s591_s14 = sphi %s624_s14, %s758_s14   ;;  %s587_s13 = sphi %s622_s13, %s757_s13   ;;  %s583_s12 = sphi %s620_s12, %s756_s12  }
   0x4   : > { %s645_s18 = sadd.s32 1, %s595_s15   ;;  %s91_s19 = sadd.s32 1, %s591_s14 }
   0x5   : > { %s88_s20 = ssub.s32 %s595_s15, %s645_s18  ;;  %p101_p0 = scmp.ne.s32.totalorder %s591_s14, %s587_s13 }
   0x6   : > { %p89_p1 = scmp.eq.s32.totalorder %s88_s20, 0  ;;  %p102_p2 = scmp.eq.s32.totalorder %s641_s16, 3 }
   0x7   : > { %p107_p3 = scmp.ne.s32.totalorder %s587_s13, %s583_s12  ;;  %p108_p4 = scmp.eq.s32.totalorder %s425_s17, 3 }
   0x8   : > { %s656_s21 = scalar_select %p89_p1, %s591_s14, %s91_s19  }
   0x9   : > { %p658_p5 = por %p102_p2, %p101_p0  ;;  %p662_p6 = por %p108_p4, %p107_p3 }
   0xa   : > { %p428_p7 = scmp.ge.s32.totalorder %s595_s15, 1  ;;  %p141_p8 = scmp.lt.s32.totalorder %s595_s15, 5 }
   0xc   : > { %p142_p9 = pnand %p428_p7, %p141_p8 }
   0xd   : > { %v174_v0 = vld [vmem:[%s751_s1] sm:$0xff] (!%p142_p9)  ;;  %v175_v1 = vld [vmem:[%s751_s1 + $0x8] sm:$0xff] (!%p142_p9)  ;;  %v176_v2 = vld [vmem:[%s751_s1 + $0x10] sm:$0xff] (!%p142_p9)  ;;  %s430_s30 = sshll.u32 (!%p142_p9), %s641_s16, 1  ;;  %vm178_vm0 = vcmask (!%p142_p9), 261120   ;;  %s162_s27 = sand.u32 (!%p142_p9), 1, %s587_s13  }
   0xe   : > { %145 = sbr.rel (%p142_p9) target bundleno = 470 (0x1d6), region = 32  ;;  %v476_v3 = vpack.c.bf16 (!%p142_p9), %v175_v1, %v174_v0  ;;  %v177_v4 = vld [vmem:[%s751_s1 + $0x18] sm:$0xff] (!%p142_p9)  ;;  %p166_p10 = scmp.lt.s32.totalorder (!%p142_p9), %s430_s30, 7  ;;  %v262_v5 = vld [vmem:[%s752_s2] sm:$0xff] (!%p142_p9)  ;;  %v263_v6 = vld [vmem:[%s752_s2 + $0x8] sm:$0xff] (!%p142_p9) }
   0xf   : > { %v480_v7 = vpack.c.bf16 (!%p142_p9), %v177_v4, %v176_v2  ;;  %v484_v8 = vpack.c.bf16 (!%p142_p9), %v263_v6, %v262_v5  ;;  %v264_v11 = vld [vmem:[%s752_s2 + $0x10] sm:$0xff] (!%p142_p9)  ;;  %v265_v12 = vld [vmem:[%s752_s2 + $0x18] sm:$0xff] (!%p142_p9)  ;;  %s429_s28 = sshll.u32 (!%p142_p9), %s162_s27, 4  ;;  %s441_s4 = sshll.u32 (!%p142_p9), %s641_s16, 8 }
  0x10   : > { %477 = vmatprep.subr.bf16.mxu0 (!%p142_p9), %v476_v3  ;;  %v488_v13 = vpack.c.bf16 (!%p142_p9), %v265_v12, %v264_v11  ;;  %s164_s29 = scalar_lea.vmem (!%p142_p9), [#allocation2], %s429_s28  ;;  %s707_s7 = scalar_lea.hbm (!%p142_p9), %s753_s3, %s441_s4 }
  0x11   : > { %479 = vmatpush3.bf16.msra.mxu0 (!%p142_p9), %v476_v3  ;;  %485 = vmatprep.subr.bf16.mxu1 (!%p142_p9), %v484_v8  ;;  %s709_s8 = scalar_lea.sflag (!%p142_p9), [#allocation3], %s162_s27  ;;  %s597_s16 = smov (!%p142_p9), [#allocation2]  }
  0x12   : > { %481 = vmatprep.subr.bf16.mxu0 (!%p142_p9), %v480_v7  ;;  %487 = vmatpush3.bf16.msra.mxu1 (!%p142_p9), %v484_v8 }
  0x13   : > { %489 = vmatprep.subr.bf16.mxu1 (!%p142_p9), %v488_v13 }
  0x15   : > { %s761_s30 = smov (!%p166_p10, %s430_s30), 7  ;;  %483 = vmatpush3.bf16.msra.mxu0 %v480_v7 }
  0x16   : > { %s431_s10 = sshll.u32 %s761_s30, 3  ;;  %491 = vmatpush3.bf16.msra.mxu1 %v488_v13  ;;  %s363_s30 = sshll.u32 %s164_s29, 4  ;;  %s702_s30 = int_to_ptr.vmem [resolvable:$true] %s363_s30 }
  0x17   : > { %s169_s19 = scalar_lea.vmem %s750_s0, %s431_s10  ;;  %s533_s9 = scalar_lea.vmem %s702_s30, 256 }
  0x18   : > { %v172_v9 = vld [vmem:[%s169_s19] sm:$0xff]  ;;  %v173_v10 = vld [vmem:[%s169_s19 + $0x8] sm:$0xff]  ;;  %p534_p11 = scmp.ne.s32.totalorder %s702_s30, %s533_s9  ;;  %s537_s10 = sshll.u32 %s597_s16, 4  ;;  %s538_s10 = int_to_ptr.vmem [resolvable:$false] %s537_s10 }
  0x19   : > { %462 = vmatprep.mubr.msk.f32.mxu0 %vm178_vm0, %v172_v9  ;;  %s539_s11 = scalar_lea.vmem %s538_s10, 512  ;;  %p540_p0 = scmp.lt.s32.totalorder %s702_s30, %s538_s10 }
  0x1a   : > { %463 = vmatmul.mubr.msk.f32.vlgmr.msra.gmra.mrb[0].mxu0 %vm178_vm0, %v173_v10  ;;  %p535_p12 = pnand %p534_p11, %p658_p5  ;;  %p541_p1 = scmp.lt.s32.totalorder %s539_s11, %s533_s9 }
  0x1c   : > { %p536_p13 = pneg %p535_p12  ;;  %p542_p2 = por %p541_p1, %p540_p0 }
  0x1e   : > { %p543_p3 = pnand %p542_p2, %p536_p13 }
  0xed   : > { %v464_v14 = vpop.f32.mrb[0].mxu0 }
  0xee   : > { %v251_v15 = vpop.f32.mrb[1].mxu0  ;;  %v261_v17 = vmax.f32 %v464_v14, 0.0 }
  0xef   : > { %v260_v16 = vmax.f32 %v251_v15, 0.0 }
  0xf1   : > { %473 = vmatprep.mubr.msk.f32.mxu1 %vm178_vm0, %v260_v16 }
  0xf2   : > { %474 = vmatmul.mubr.msk.f32.vlgmr.msra.gmra.mrb[0].mxu1 %vm178_vm0, %v261_v17 }
 0x1c5   : > { %v475_v18 = vpop.f32.mrb[0].mxu1 }
 0x1c6   : > { %348 = vst [vmem:[%s164_s29 + $0x8] sm:$0xff] %v475_v18  ;;  %v338_v19 = vpop.f32.mrb[1].mxu1 }
 0x1c7   : > { %347 = vst [vmem:[%s164_s29] sm:$0xff] %v338_v19 }
 0x1c8   : > { %546 = shalt.err (!%p543_p3)
}
 0x1c9   : > { %s547_s17 = scalar_lea.hbm %s707_s7, 256  ;;  %s551_s24 = scalar_lea.hbm %s753_s3, 1024 }
 0x1ca   : > { %p548_p4 = scmp.ne.s32.totalorder %s707_s7, %s547_s17  ;;  %p552_p9 = scmp.lt.u32.totalorder %s707_s7, %s753_s3 }
 0x1cb   : > { %p553_p10 = scmp.lt.u32.totalorder %s551_s24, %s547_s17  ;;  %p555_p12 = scmp.lt.u32.totalorder %s547_s17, %s707_s7 }
 0x1cc   : > { %p549_p7 = pnand %p548_p4, %p658_p5 }
 0x1cd   : > { %p554_p11 = por %p553_p10, %p552_p9 }
 0x1ce   : > { %p550_p8 = pneg %p549_p7 }
 0x1cf   : > { %p556_p13 = por %p555_p12, %p554_p11 }
 0x1d1   : > { %p557_p0 = pnand %p556_p13, %p550_p8 }
 0x1d3   : > { %560 = shalt.err (!%p557_p0)
}
 0x1d4   : > { %s598_s27 = smov 128   ;;  %s599_s28 = smov 8  }
 0x1d5   : > { %492 = dma.vmem_to_hbm [thread:$0]  (%p658_p5), %s702_s30, 256, %s707_s7, %s709_s8, %s598_s27, %s598_s27, %s599_s28  }
 0x1d6 PF: > { %p498_p1 = scmp.ge.s32.totalorder %s595_s15, 2  ;;  %s378_s29 = sand.u32 1, %s583_s12  }
 0x1d7   : > { %s379_s4 = scalar_lea.sflag [#allocation3], %s378_s29 }
 0x1d8   : > { %p495_p2 = pnand %p498_p1, %p662_p6 }
 0x1da   : > { %578 = dma.done.wait (!%p495_p2), %s379_s4, 256  }
 0x1db   : > { %580 = vsyncadd (!%p495_p2), %s379_s4, 4294967040  ;;  %p13_p3 = scmp.ge.s32.totalorder %s645_s18, 6   ;;  %s756_s12 = smov %s587_s13 }
 0x1dc   : > { %s757_s13 = smov %s591_s14  ;;  %s758_s14 = smov %s656_s21 }
 0x1dd   : > { %s759_s15 = smov %s645_s18  ;;  %15 = sbr.rel (!%p13_p3) target bundleno = 3 (0x3), region = 67 }
 0x1e4   :  { %384 = vsyncpa [#allocation3], 1 }
 0x1e5   :  { %386 = vsyncpa [#allocation3 + $0x1], 1 }

</bundles_post_ra>
